<compile_context>
chip_gen: v5e
topology: v5e:2x2
jax: 0.10.0
libtpu: 0.0.40
codegen_flags: <defaults>
</compile_context>

<pallas_src>
import jax
import jax.numpy as jnp
from jax.experimental import pallas as pl
from jax.experimental.pallas import tpu as pltpu


def _make_corr2d_kernel(kh: int, kw: int, oh: int, ow: int):
    """Kernel body: one image's 2-D cross-correlation + bias, VPU MAC form."""

    def corr2d_kernel(wb_ref, x_ref, o_ref):
        # Hoist all SMEM scalar reads (kh*kw weights + bias) out of the MAC loop.
        w = [wb_ref[t] for t in range(kh * kw)]
        b = wb_ref[kh * kw]

        # Single full load of the image; every tap reuses this value.
        xv = x_ref[...]                                   # (H, W) f32

        # Fold the bias into the first tap (saves one full-array add pass).
        acc = w[0] * xv[0:oh, 0:ow] + b

        # Remaining taps: static (i, j) windows of the loaded value.
        for i in range(kh):
            for j in range(kw):
                if i == 0 and j == 0:
                    continue
                acc = acc + w[i * kw + j] * xv[i:i + oh, j:j + ow]

        o_ref[...] = acc

    return corr2d_kernel


def conv2d_pallas(x, weight, bias):
    """corr2d(x, weight) + bias, matching the PyTorch Conv2D.forward.

    Accepts x of shape (H, W) (module semantics) or (B, H, W) (batched,
    one image per grid step in a single pallas_call).
    """
    x = jnp.asarray(x, jnp.float32)
    weight = jnp.asarray(weight, jnp.float32)
    bias = jnp.asarray(bias, jnp.float32)

    kh, kw = weight.shape
    # Weights + bias as one tiny 1-D SMEM vector (avoids 2-D SMEM padding).
    wb = jnp.concatenate([weight.reshape(-1), bias.reshape(-1)])

    single = (x.ndim == 2)
    if single:
        H, W = x.shape
        B = 1
    else:
        B, H, W = x.shape
    oh, ow = H - kh + 1, W - kw + 1
    assert oh > 0 and ow > 0, "kernel larger than image"

    kernel = _make_corr2d_kernel(kh, kw, oh, ow)

    cost = pl.CostEstimate(
        flops=2 * B * kh * kw * oh * ow,
        transcendentals=0,
        bytes_accessed=4 * (B * H * W + B * oh * ow + kh * kw + 1),
    )

    if single:
        # Grid-less: whole (unpadded) image as one block; full-dims blocks are
        # exempt from the (8,128) divisibility rule.
        return pl.pallas_call(
            kernel,
            out_shape=jax.ShapeDtypeStruct((oh, ow), jnp.float32),
            in_specs=[
                pl.BlockSpec(memory_space=pltpu.SMEM),        # weights+bias
                pl.BlockSpec((H, W), lambda: (0, 0)),         # image (VMEM)
            ],
            out_specs=pl.BlockSpec((oh, ow), lambda: (0, 0)),
            cost_estimate=cost,
        )(wb, x)

    # Batched: one image per grid step; "parallel" shards the batch axis
    # across both v7x TensorCores (no-op on v5e/v6e).
    return pl.pallas_call(
        kernel,
        out_shape=jax.ShapeDtypeStruct((B, oh, ow), jnp.float32),
        grid=(B,),
        in_specs=[
            pl.BlockSpec(memory_space=pltpu.SMEM),            # weights+bias
            pl.BlockSpec((None, H, W), lambda b: (b, 0, 0)),  # image b (VMEM)
        ],
        out_specs=pl.BlockSpec((None, oh, ow), lambda b: (b, 0, 0)),
        compiler_params=pltpu.CompilerParams(dimension_semantics=("parallel",)),
        cost_estimate=cost,
    )(wb, x)


def conv2d_ref(x, weight, bias):
    """Pure-JAX reference of corr2d(x, weight) + bias (supports leading batch)."""
    kh, kw = weight.shape
    H, W = x.shape[-2], x.shape[-1]
    oh, ow = H - kh + 1, W - kw + 1
    out = jnp.zeros(x.shape[:-2] + (oh, ow), jnp.float32)
    for i in range(kh):
        for j in range(kw):
            out = out + weight[i, j] * x[..., i:i + oh, j:j + ow]
    return out + bias[0]


if __name__ == "__main__":
    key = jax.random.PRNGKey(0)
    k_x, k_w, k_b = jax.random.split(key, 3)

    H, W = 16, 16
    kernel_size = (3, 3)

    # nn.Parameter(torch.rand(kernel_size)) -> uniform [0, 1); deterministic here.
    weight = jax.random.uniform(k_w, kernel_size, dtype=jnp.float32)
    # nn.Parameter(torch.zeros(1))
    bias = jnp.zeros((1,), dtype=jnp.float32)

    # --- single 2-D image: exactly the module's forward ---
    x = jax.random.normal(k_x, (H, W), dtype=jnp.float32)
    out = jax.block_until_ready(conv2d_pallas(x, weight, bias))
    expected = conv2d_ref(x, weight, bias)
    assert out.shape == (H - kernel_size[0] + 1, W - kernel_size[1] + 1)
    assert jnp.allclose(out, expected, atol=1e-5, rtol=1e-5), "single-image mismatch"

    # --- batched path (one image per grid step, single pallas_call) ---
    xb = jax.random.normal(k_b, (2, H, W), dtype=jnp.float32)
    outb = jax.block_until_ready(conv2d_pallas(xb, weight, bias))
    expectedb = conv2d_ref(xb, weight, bias)
    assert outb.shape == (2, H - kernel_size[0] + 1, W - kernel_size[1] + 1)
    assert jnp.allclose(outb, expectedb, atol=1e-5, rtol=1e-5), "batched mismatch"

    print("KERNEL_OK")
</pallas_src>

<mosaic_0001>
module attributes {stable_mosaic.version = 11 : i64} {
  func.func @corr2d_kernel(%arg0: memref<10xf32, #tpu.memory_space<smem>>, %arg1: memref<16x16xf32, #tpu.memory_space<vmem>>, %arg2: memref<14x14xf32, #tpu.memory_space<vmem>>) attributes {dimension_semantics = [], scalar_prefetch = 0 : i64, scratch_operands = 0 : i64, tpu.core_type = #tpu.core_type<tc>} {
    %c0 = arith.constant 0 : index
    %0 = memref.load %arg0[%c0] : memref<10xf32, #tpu.memory_space<smem>>
    %c1 = arith.constant 1 : index
    %1 = memref.load %arg0[%c1] : memref<10xf32, #tpu.memory_space<smem>>
    %c2 = arith.constant 2 : index
    %2 = memref.load %arg0[%c2] : memref<10xf32, #tpu.memory_space<smem>>
    %c3 = arith.constant 3 : index
    %3 = memref.load %arg0[%c3] : memref<10xf32, #tpu.memory_space<smem>>
    %c4 = arith.constant 4 : index
    %4 = memref.load %arg0[%c4] : memref<10xf32, #tpu.memory_space<smem>>
    %c5 = arith.constant 5 : index
    %5 = memref.load %arg0[%c5] : memref<10xf32, #tpu.memory_space<smem>>
    %c6 = arith.constant 6 : index
    %6 = memref.load %arg0[%c6] : memref<10xf32, #tpu.memory_space<smem>>
    %c7 = arith.constant 7 : index
    %7 = memref.load %arg0[%c7] : memref<10xf32, #tpu.memory_space<smem>>
    %c8 = arith.constant 8 : index
    %8 = memref.load %arg0[%c8] : memref<10xf32, #tpu.memory_space<smem>>
    %c9 = arith.constant 9 : index
    %9 = memref.load %arg0[%c9] : memref<10xf32, #tpu.memory_space<smem>>
    %c0_0 = arith.constant 0 : index
    %c0_1 = arith.constant 0 : index
    %10 = vector.load %arg1[%c0_0, %c0_1] : memref<16x16xf32, #tpu.memory_space<vmem>>, vector<16x16xf32>
    %11 = vector.extract_strided_slice %10 {offsets = [0, 0], sizes = [14, 14], strides = [1, 1]} : vector<16x16xf32> to vector<14x14xf32>
    %12 = vector.broadcast %0 : f32 to vector<14x14xf32>
    %13 = arith.mulf %12, %11 : vector<14x14xf32>
    %14 = vector.broadcast %9 : f32 to vector<14x14xf32>
    %15 = arith.addf %13, %14 : vector<14x14xf32>
    %16 = vector.extract_strided_slice %10 {offsets = [0, 1], sizes = [14, 14], strides = [1, 1]} : vector<16x16xf32> to vector<14x14xf32>
    %17 = vector.broadcast %1 : f32 to vector<14x14xf32>
    %18 = arith.mulf %17, %16 : vector<14x14xf32>
    %19 = arith.addf %15, %18 : vector<14x14xf32>
    %20 = vector.extract_strided_slice %10 {offsets = [0, 2], sizes = [14, 14], strides = [1, 1]} : vector<16x16xf32> to vector<14x14xf32>
    %21 = vector.broadcast %2 : f32 to vector<14x14xf32>
    %22 = arith.mulf %21, %20 : vector<14x14xf32>
    %23 = arith.addf %19, %22 : vector<14x14xf32>
    %24 = vector.extract_strided_slice %10 {offsets = [1, 0], sizes = [14, 14], strides = [1, 1]} : vector<16x16xf32> to vector<14x14xf32>
    %25 = vector.broadcast %3 : f32 to vector<14x14xf32>
    %26 = arith.mulf %25, %24 : vector<14x14xf32>
    %27 = arith.addf %23, %26 : vector<14x14xf32>
    %28 = vector.extract_strided_slice %10 {offsets = [1, 1], sizes = [14, 14], strides = [1, 1]} : vector<16x16xf32> to vector<14x14xf32>
    %29 = vector.broadcast %4 : f32 to vector<14x14xf32>
    %30 = arith.mulf %29, %28 : vector<14x14xf32>
    %31 = arith.addf %27, %30 : vector<14x14xf32>
    %32 = vector.extract_strided_slice %10 {offsets = [1, 2], sizes = [14, 14], strides = [1, 1]} : vector<16x16xf32> to vector<14x14xf32>
    %33 = vector.broadcast %5 : f32 to vector<14x14xf32>
    %34 = arith.mulf %33, %32 : vector<14x14xf32>
    %35 = arith.addf %31, %34 : vector<14x14xf32>
    %36 = vector.extract_strided_slice %10 {offsets = [2, 0], sizes = [14, 14], strides = [1, 1]} : vector<16x16xf32> to vector<14x14xf32>
    %37 = vector.broadcast %6 : f32 to vector<14x14xf32>
    %38 = arith.mulf %37, %36 : vector<14x14xf32>
    %39 = arith.addf %35, %38 : vector<14x14xf32>
    %40 = vector.extract_strided_slice %10 {offsets = [2, 1], sizes = [14, 14], strides = [1, 1]} : vector<16x16xf32> to vector<14x14xf32>
    %41 = vector.broadcast %7 : f32 to vector<14x14xf32>
    %42 = arith.mulf %41, %40 : vector<14x14xf32>
    %43 = arith.addf %39, %42 : vector<14x14xf32>
    %44 = vector.extract_strided_slice %10 {offsets = [2, 2], sizes = [14, 14], strides = [1, 1]} : vector<16x16xf32> to vector<14x14xf32>
    %45 = vector.broadcast %8 : f32 to vector<14x14xf32>
    %46 = arith.mulf %45, %44 : vector<14x14xf32>
    %47 = arith.addf %43, %46 : vector<14x14xf32>
    %c0_2 = arith.constant 0 : index
    %c0_3 = arith.constant 0 : index
    %48 = vector.load %arg2[%c0_2, %c0_3] : memref<14x14xf32, #tpu.memory_space<vmem>>, vector<14x14xf32>
    tpu.vector_store %arg2[%c0_2, %c0_3], %47 {strides = array<i32>} : memref<14x14xf32, #tpu.memory_space<vmem>>, vector<14x14xf32>,
    return
  }
}

</mosaic_0001>

<bundles_post_ra>
// kernel: tpu_custom_call.1
= control target key start
LH: loop header
LB: loop body
LE: loop exit
PB: predicated region body
PF: predicated region fallthrough
CT: control target
= control target key end

     0   :  { %7 = vsyncpa [#allocation5], 0  ;;  %s358_s0 = inlined_call_operand.hbm [shape: f32[10], index: 0, kind: input, shape index: {}]   ;;  %s359_s1 = inlined_call_operand.hbm [shape: f32[16,16], index: 1, kind: input, shape index: {}]   ;;  %s360_s2 = inlined_call_operand.hbm [shape: f32[14,14], index: 2, kind: output, shape index: {}]  }
   0x1   :  { %8 = vsyncpa [#allocation3], 0 }
   0x2   :  { %9 = vsyncpa [#allocation4], 0  ;;  %s15_s11 = sshll.u32 %s358_s0, 4  ;;  %s23_s14 = sshll.u32 %s359_s1, 4  ;;  %s16_s11 = int_to_ptr.hbm [resolvable:$true] %s15_s11  ;;  %s24_s14 = int_to_ptr.hbm [resolvable:$true] %s23_s14 }
   0x3   :  { %s281_s15 = smov [#allocation2]   ;;  %s282_s16 = smov [#allocation6]  }
   0x4   :  { %18 = dma.hbm_to_smem %s16_s11, 16, %s281_s15, [#allocation5]  }
   0x5   :  { %s25_s17 = sshll.u32 %s282_s16, 4  ;;  %s283_s18 = smov 128   ;;  %s26_s17 = int_to_ptr.vmem [resolvable:$true] %s25_s17 }
   0x6   :  { %s284_s19 = smov 8  }
   0x7   :  { %31 = dma.hbm_to_vmem [thread:$0]  %s24_s14, 256, %s26_s17, [#allocation3], %s283_s18, %s283_s18, %s284_s19  }
   0x8   :  { %275 = dma.done.wait [#allocation5], 16  }
   0x9   :  { %276 = vsyncadd [#allocation5], 4294967280 }
   0xa   :  { %277 = dma.done.wait [#allocation3], 256  }
   0xb   :  { %278 = vsyncadd [#allocation3], 4294967040 }
   0xc   :  { %40 = sfence }
   0xd   :  { %s200_s0 = sld [smem:[#allocation2 + $0x2]]  ;;  %v312_v0 = vld [vmem:[#allocation6] sm:$0xff]  ;;  %v316_v5 = vld [vmem:[#allocation6 + $0x8] sm:$0xff]  ;;  %s285_s22 = smov 126   ;;  %vm90_vm0 = vcmask 1046528   ;;  %vm135_vm1 = vcmask 1045504  }
   0xe   :  { %s199_s20 = sld [smem:[#allocation2 + $0x1]]  ;;  %s286_s24 = smov 127   ;;  %vm175_vm2 = vcmask 113664   ;;  %vm177_vm3 = vcmask 111616  }
   0xf   :  { %s202_s1 = sld [smem:[#allocation2 + $0x4]]  ;;  %s287_s30 = smov [#allocation7]  }
  0x10   :  { %s203_s21 = sld [smem:[#allocation2 + $0x5]]  ;;  %s183_s3 = sshll.u32 %s287_s30, 4  ;;  %s184_s3 = int_to_ptr.vmem [resolvable:$true] %s183_s3 }
  0x11   :  { %s206_s23 = sld [smem:[#allocation2 + $0x8]]  ;;  %s185_s6 = sshll.u32 %s360_s2, 4  ;;  %s186_s6 = int_to_ptr.hbm [resolvable:$true] %s185_s6 }
  0x12   :  { %s205_s25 = sld [smem:[#allocation2 + $0x7]] }
  0x13   :  { %v72_v1 = vstv %s200_s0  ;;  %s41_s26 = sld [smem:[#allocation2]] }
  0x14   :  { %v73_v2 = vmul.f32 %v72_v1, %v312_v0  ;;  %v59_v3 = vstv %s199_s20  ;;  %v74_v11 = vmul.f32 %v72_v1, %v316_v5  ;;  %s207_s27 = sld [smem:[#allocation2 + $0x9]] }
  0x15   :  { %v60_v4 = vmul.f32 %v59_v3, %v312_v0  ;;  %v98_v6 = vstv %s202_s1  ;;  %v61_v12 = vmul.f32 %v59_v3, %v316_v5  ;;  %s201_s28 = sld [smem:[#allocation2 + $0x3]] }
  0x16   :  { %77 = vrot.lane.b32.xlu1 %v73_v2, %s285_s22  ;;  %v100_v7 = vmul.f32 %v98_v6, %v316_v5  ;;  %v99_v8 = vmul.f32 %v98_v6, %v312_v0  ;;  %v114_v9 = vstv %s203_s21  ;;  %s204_s29 = sld [smem:[#allocation2 + $0x6]] }
  0x17   :  { %64 = vrot.lane.b32.xlu0 %v60_v4, %s286_s24  ;;  %v115_v13 = vmul.f32 %v114_v9, %v312_v0  ;;  %v116_v14 = vmul.f32 %v114_v9, %v316_v5  ;;  %v159_v16 = vstv %s206_s23 }
  0x18   :  { %v104_v10 = vrot.slane %v100_v7, 1  ;;  %v103_v15 = vrot.slane %v99_v8, 1  ;;  %v143_v17 = vstv %s205_s25  ;;  %v160_v23 = vmul.f32 %v159_v16, %v312_v0 }
  0x19   :  { %v120_v18 = vrot.slane %v116_v14, 1  ;;  %v119_v19 = vrot.slane %v115_v13, 1  ;;  %v144_v20 = vmul.f32 %v143_v17, %v312_v0  ;;  %v145_v22 = vmul.f32 %v143_v17, %v316_v5 }
  0x1a   :  { %108 = vrot.lane.b32.xlu2 %v104_v10, %s286_s24  ;;  %v105_v21 = vsel %vm90_vm0, %v103_v15, %v104_v10  ;;  %v161_v24 = vmul.f32 %v159_v16, %v316_v5  ;;  %v164_v28 = vrot.slane %v160_v23, 2  ;;  %v53_v32 = vstv %s41_s26 }
  0x1b   :  { %v121_v25 = vsel %vm90_vm0, %v119_v19, %v120_v18  ;;  %v148_v26 = vrot.slane %v144_v20, 2  ;;  %v149_v27 = vrot.slane %v145_v22, 2  ;;  %v54_v33 = vmul.f32 %v53_v32, %v312_v0 }
  0x1c   :  { %v165_v29 = vrot.slane %v161_v24, 2  ;;  %v56_v35 = vstv %s207_s27  ;;  %v85_v36 = vstv %s201_s28  ;;  %v55_v42 = vmul.f32 %v53_v32, %v316_v5 }
  0x1d   :  { %v150_v30 = vsel %vm135_vm1, %v148_v26, %v149_v27  ;;  %v57_v38 = vadd.f32 %v56_v35, %v54_v33  ;;  %v86_v40 = vmul.f32 %v85_v36, %v312_v0  ;;  %v87_v41 = vmul.f32 %v85_v36, %v316_v5 }
  0x1e   :  { %79 = vrot.lane.b32.xlu1 %v74_v11, %s285_s22  ;;  %v166_v31 = vsel %vm135_vm1, %v164_v28, %v165_v29  ;;  %v58_v46 = vadd.f32 %v56_v35, %v55_v42  ;;  %v130_v47 = vstv %s204_s29 }
  0x1f   :  { %66 = vrot.lane.b32.xlu0 %v61_v12, %s286_s24  ;;  %v91_v44 = vrot.slane %v86_v40, 1  ;;  %v92_v45 = vrot.slane %v87_v41, 1  ;;  %v131_v53 = vmul.f32 %v130_v47, %v312_v0  ;;  %v132_v54 = vmul.f32 %v130_v47, %v316_v5 }
  0x21   :  { %v93_v51 = vsel %vm90_vm0, %v91_v44, %v92_v45  ;;  %v136_v58 = vrot.slane %v131_v53, 2  ;;  %v137_v59 = vrot.slane %v132_v54, 2 }
  0x22   :  { %106 = vrot.lane.b32.xlu2 %v105_v21, %s286_s24 }
  0x23   :  { %v138_v3 = vsel %vm135_vm1, %v136_v58, %v137_v59 }
  0x26   :  { %124 = vrot.lane.b32.xlu1 %v120_v18, %s285_s22 }
  0x27   :  { %122 = vrot.lane.b32.xlu0 %v121_v25, %s285_s22 }
  0x2a   :  { %151 = vrot.lane.b32.xlu2 %v150_v30, %s286_s24 }
  0x2e   :  { %167 = vrot.lane.b32.xlu1 %v166_v31, %s285_s22 }
  0x2f   :  { %153 = vrot.lane.b32.xlu0 %v149_v27, %s286_s24 }
  0x32   :  { %169 = vrot.lane.b32.xlu2 %v165_v29, %s285_s22 }
  0x74   :  { %v109_v34 = vpop.permute.xlu2 %108 }
  0x7c   :  { %v107_v48 = vpop.permute.xlu2 %106 }
  0x84   :  { %v152_v61 = vpop.permute.xlu2 %151 }
  0x88   :  { %v78_v37 = vpop.permute.xlu1 %77 }
  0x89   :  { %v65_v39 = vpop.permute.xlu0 %64 }
  0x8a   :  { %v70_v43 = vadd.f32 %v65_v39, %v57_v38 }
  0x8c   :  { %v83_v49 = vadd.f32 %v78_v37, %v70_v43  ;;  %v170_v11 = vpop.permute.xlu2 %169 }
  0x8e   :  { %v96_v56 = vadd.f32 %v93_v51, %v83_v49 }
  0x90   :  { %v80_v50 = vpop.permute.xlu1 %79  ;;  %v112_v62 = vadd.f32 %v107_v48, %v96_v56 }
  0x91   :  { %v67_v52 = vpop.permute.xlu0 %66 }
  0x92   :  { %v71_v55 = vadd.f32 %v67_v52, %v58_v46 }
  0x94   :  { %v84_v57 = vadd.f32 %v80_v50, %v71_v55 }
  0x96   :  { %v97_v60 = vadd.f32 %v92_v45, %v84_v57 }
  0x98   :  { %v125_v63 = vpop.permute.xlu1 %124  ;;  %v113_v1 = vadd.f32 %v109_v34, %v97_v60 }
  0x99   :  { %v123_v2 = vpop.permute.xlu0 %122 }
  0x9a   :  { %v128_v4 = vadd.f32 %v123_v2, %v112_v62  ;;  %v129_v6 = vadd.f32 %v125_v63, %v113_v1 }
  0x9c   :  { %v141_v7 = vadd.f32 %v138_v3, %v128_v4  ;;  %v142_v5 = vadd.f32 %v137_v59, %v129_v6 }
  0x9e   :  { %v157_v8 = vadd.f32 %v152_v61, %v141_v7 }
  0xa0   :  { %v168_v0 = vpop.permute.xlu1 %167 }
  0xa1   :  { %v173_v9 = vadd.f32 %v168_v0, %v157_v8  ;;  %v154_v10 = vpop.permute.xlu0 %153 }
  0xa2   :  { %v158_v12 = vadd.f32 %v154_v10, %v142_v5 }
  0xa3   :  { %176 = vst.msk [vmem:[#allocation7] sm:$0xff] %vm175_vm2, %v173_v9 }
  0xa4   :  { %v174_v13 = vadd.f32 %v170_v11, %v158_v12 }
  0xa6   :  { %178 = vst.msk [vmem:[#allocation7 + $0x8] sm:$0x3f] %vm177_vm3, %v174_v13 }
  0xa7   :  { %191 = dma.vmem_to_hbm [thread:$0]  %s184_s3, 256, %s186_s6, [#allocation4], %s283_s18, %s283_s18, %s284_s19  }
  0xa8   :  { %279 = dma.done.wait [#allocation4], 256  }
  0xa9   :  { %280 = vsyncadd [#allocation4], 4294967040 }
  0xaa   :  { %196 = vsyncpa [#allocation3], 1 }
  0xab   :  { %197 = vsyncpa [#allocation4], 1 }
  0xac   :  { %198 = vsyncpa [#allocation5], 1 }

</bundles_post_ra>
